<compile_context>
chip_gen: v7x
topology: tpu7x:2x2x1
jax: 0.10.0
libtpu: 0.0.40
codegen_flags: <defaults>
</compile_context>

<pallas_src>
import jax
import jax.numpy as jnp
from jax.experimental import pallas as pl
from jax.experimental.pallas import tpu as pltpu


def _round_up(n, m):
    return ((n + m - 1) // m) * m


def _choose_bt(batch):
    """Batch tile: multiple of 128 (lane-dense), large enough to amortize the
    per-grid-step overhead, small enough that large batches keep >= ~8 grid
    steps (megacore + pipelining).  Double-buffered VMEM use is ~26*BT bytes,
    far under every generation's scoped-VMEM default."""
    b128 = _round_up(batch, 128)
    if b128 <= 512:
        return b128                          # tiny problem: one small tile
    bt = _round_up(-(-b128 // 8), 512)       # aim for ~8 tiles, 512-aligned
    return int(min(max(bt, 512), 8192))


def _make_kernel(bt, chunk):
    n_chunks = bt // chunk

    def kernel(x_ref, w1_ref, w2_ref, b2_ref, o_ref):
        """One batch tile, feature-major layout.

        x_ref : (11, bt) bf16  -- [x^T ; ones] (batch on lanes / MXU-N axis)
        w1_ref: (50, 11) bf16  -- fc1 weight with b1 folded in as last column
        w2_ref: (1, 50)  bf16  -- fc2 weight row
        b2_ref: (1, 1)   f32   -- fc2 bias (SMEM scalar)
        o_ref : (1, bt)  f32   -- y^T for this tile (lane-dense stores)
        """
        w1 = w1_ref[...]          # resident; hoisted out of the chunk loop
        w2 = w2_ref[...]
        b2 = b2_ref[0, 0]

        @pl.loop(0, n_chunks)
        def _(c):
            j = pl.multiple_of(c * chunk, chunk)
            xc = x_ref[:, pl.ds(j, chunk)]                             # (11, C) bf16
            # fc1 (+ folded bias) on the MXU, f32 accumulation.
            h = jnp.dot(w1, xc, preferred_element_type=jnp.float32)    # (50, C) f32
            h = jnp.maximum(h, 0.0).astype(jnp.bfloat16)               # ReLU (VPU)
            # fc2 (50 -> 1) also on the MXU (idle otherwise), f32 accumulation.
            y = jnp.dot(w2, h, preferred_element_type=jnp.float32)     # (1, C) f32
            o_ref[:, pl.ds(j, chunk)] = y + b2

    return kernel


@jax.jit
def my_model_forward(x, w1, b1, w2, b2):
    """x: (B, 10) f32.  Params in PyTorch layout:
       w1 (50, 10), b1 (50,), w2 (1, 50), b2 (1,).  Returns (B, 1) f32."""
    batch, in_features = x.shape
    hidden = w1.shape[0]
    k_aug = in_features + 1                     # features + ones row (bias fold)

    bt = _choose_bt(batch)
    chunk = min(512, bt)
    b_pad = _round_up(batch, bt)
    n_tiles = b_pad // bt

    # Feature-major activations with a ones row, built in one fused
    # cast + transpose + concat (+ tail pad) pass -- no full-array zero init.
    x_t = jnp.concatenate(
        [x.astype(jnp.bfloat16).T, jnp.ones((1, batch), jnp.bfloat16)], axis=0)
    if b_pad != batch:
        x_t = jnp.pad(x_t, ((0, 0), (0, b_pad - batch)))               # (11, b_pad)

    w1_aug = jnp.concatenate([w1, b1.reshape(-1, 1)], axis=1).astype(jnp.bfloat16)
    w2_row = w2.reshape(1, -1).astype(jnp.bfloat16)                    # (1, 50)
    b2_s = b2.reshape(1, 1).astype(jnp.float32)                        # SMEM scalar

    y_t = pl.pallas_call(
        _make_kernel(bt, chunk),
        out_shape=jax.ShapeDtypeStruct((1, b_pad), jnp.float32),
        grid=(n_tiles,),
        in_specs=[
            pl.BlockSpec((k_aug, bt), lambda i: (0, i)),            # x^T: streamed
            pl.BlockSpec((hidden, k_aug), lambda i: (0, 0)),        # W1|b1: resident
            pl.BlockSpec((1, hidden), lambda i: (0, 0)),            # W2 row: resident
            pl.BlockSpec(memory_space=pltpu.MemorySpace.SMEM),      # b2 scalar
        ],
        out_specs=pl.BlockSpec((1, bt), lambda i: (0, i)),          # lane-dense out
        compiler_params=pltpu.CompilerParams(
            dimension_semantics=("parallel",)),                     # megacore
    )(x_t, w1_aug, w2_row, b2_s)

    # (1, b_pad) -> (B, 1), dropping padded columns.
    return y_t[0, :batch].reshape(batch, 1)


def init_params(key):
    # PyTorch default Linear init: U(-1/sqrt(fan_in), 1/sqrt(fan_in)).
    k1, k2, k3, k4 = jax.random.split(key, 4)
    bound1 = 1.0 / jnp.sqrt(10.0)
    bound2 = 1.0 / jnp.sqrt(50.0)
    w1 = jax.random.uniform(k1, (50, 10), jnp.float32, -bound1, bound1)  # (out, in)
    b1 = jax.random.uniform(k2, (50,), jnp.float32, -bound1, bound1)
    w2 = jax.random.uniform(k3, (1, 50), jnp.float32, -bound2, bound2)   # (out, in)
    b2 = jax.random.uniform(k4, (1,), jnp.float32, -bound2, bound2)
    return w1, b1, w2, b2


def _reference(x, w1, b1, w2, b2, quantized):
    f32 = jnp.float32
    if quantized:
        # Mirrors the kernel's bf16 quantization (x, W1, b1, relu(h), W2 in bf16;
        # f32 accumulation) -- deliberate precision trade-off for MXU use.
        xq = x.astype(jnp.bfloat16).astype(f32)
        w1q = w1.astype(jnp.bfloat16).astype(f32)
        b1q = b1.astype(jnp.bfloat16).astype(f32)
        w2q = w2.astype(jnp.bfloat16).astype(f32)
        h = jnp.maximum(xq @ w1q.T + b1q, 0.0)
        hq = h.astype(jnp.bfloat16).astype(f32)
        return hq @ w2q.T + b2
    return jnp.maximum(x @ w1.T + b1, 0.0) @ w2.T + b2


if __name__ == "__main__":
    key = jax.random.PRNGKey(0)
    kp, kx1, kx2 = jax.random.split(key, 3)
    w1, b1, w2, b2 = init_params(kp)

    # Small case: single tile, exercises 200 -> 256 lane padding.
    B1 = 200
    x1 = jax.random.normal(kx1, (B1, 10), jnp.float32)
    out1 = jax.block_until_ready(my_model_forward(x1, w1, b1, w2, b2))
    assert out1.shape == (B1, 1)
    assert jnp.allclose(out1, _reference(x1, w1, b1, w2, b2, True),
                        atol=1e-3, rtol=1e-3)
    assert jnp.allclose(out1, _reference(x1, w1, b1, w2, b2, False),
                        atol=5e-2, rtol=5e-2)

    # Larger case: multi-tile grid + in-kernel chunk loop + batch padding.
    B2 = 4500
    x2 = jax.random.normal(kx2, (B2, 10), jnp.float32)
    out2 = jax.block_until_ready(my_model_forward(x2, w1, b1, w2, b2))
    assert out2.shape == (B2, 1)
    assert jnp.allclose(out2, _reference(x2, w1, b1, w2, b2, True),
                        atol=1e-3, rtol=1e-3)
    assert jnp.allclose(out2, _reference(x2, w1, b1, w2, b2, False),
                        atol=5e-2, rtol=5e-2)

    print("KERNEL_OK")
</pallas_src>

<mosaic_0001>
module attributes {stable_mosaic.version = 11 : i64} {
  func.func @kernel(%arg0: i32, %arg1: memref<11x256xbf16, #tpu.memory_space<vmem>>, %arg2: memref<50x11xbf16, #tpu.memory_space<vmem>>, %arg3: memref<1x50xbf16, #tpu.memory_space<vmem>>, %arg4: memref<1x1xf32, #tpu.memory_space<smem>>, %arg5: memref<1x256xf32, #tpu.memory_space<vmem>>) attributes {dimension_semantics = [#tpu.dimension_semantics<parallel>], iteration_bounds = array<i64: 1>, scalar_prefetch = 0 : i64, scratch_operands = 0 : i64, tpu.core_type = #tpu.core_type<tc>, window_params = [{transform_indices = @transform_0, window_bounds = array<i64: 11, 256>}, {pipeline_mode = #tpu.pipeline_mode<synchronous>, transform_indices = @transform_1, window_bounds = array<i64: 50, 11>}, {pipeline_mode = #tpu.pipeline_mode<synchronous>, transform_indices = @transform_2, window_bounds = array<i64: 1, 50>}, {transform_indices = @transform_3, window_bounds = array<i64: 1, 1>}, {transform_indices = @transform_4, window_bounds = array<i64: 1, 256>}]} {
    %c0 = arith.constant 0 : index
    %c0_0 = arith.constant 0 : index
    %0 = vector.load %arg2[%c0, %c0_0] : memref<50x11xbf16, #tpu.memory_space<vmem>>, vector<50x11xbf16>
    %c0_1 = arith.constant 0 : index
    %c0_2 = arith.constant 0 : index
    %1 = vector.load %arg3[%c0_1, %c0_2] : memref<1x50xbf16, #tpu.memory_space<vmem>>, vector<1x50xbf16>
    %c0_3 = arith.constant 0 : index
    %c0_4 = arith.constant 0 : index
    %2 = memref.load %arg4[%c0_3, %c0_4] : memref<1x1xf32, #tpu.memory_space<smem>>
    %c0_i32 = arith.constant 0 : i32
    %c1_i32 = arith.constant 1 : i32
    %3 = arith.muli %c0_i32, %c1_i32 : i32
    %c0_i32_5 = arith.constant 0 : i32
    %4 = arith.addi %c0_i32_5, %3 : i32
    %c256_i32 = arith.constant 256 : i32
    %5 = arith.muli %4, %c256_i32 : i32
    %6 = tpu.assume_multiple %5, 256 : i32
    %c0_6 = arith.constant 0 : index
    %7 = arith.index_cast %6 : i32 to index
    %8 = vector.load %arg1[%c0_6, %7] : memref<11x256xbf16, #tpu.memory_space<vmem>>, vector<11x256xbf16>
    %cst = arith.constant dense<0.000000e+00> : vector<50x256xf32>
    %9 = tpu.matmul %0, %8, %cst {dimension_numbers = #tpu.dot_dimension_numbers<[1], [0], [0], [1], [0, 0, 1, 1], [], []>} : vector<50x11xbf16>, vector<11x256xbf16>, vector<50x256xf32> -> vector<50x256xf32>
    %cst_7 = arith.constant 0.000000e+00 : f32
    %10 = vector.broadcast %cst_7 : f32 to vector<50x256xf32>
    %11 = arith.maximumf %9, %10 : vector<50x256xf32>
    %12 = arith.truncf %11 : vector<50x256xf32> to vector<50x256xbf16>
    %cst_8 = arith.constant dense<0.000000e+00> : vector<1x256xf32>
    %13 = tpu.matmul %1, %12, %cst_8 {dimension_numbers = #tpu.dot_dimension_numbers<[1], [0], [0], [1], [0, 0, 1, 1], [], []>} : vector<1x50xbf16>, vector<50x256xbf16>, vector<1x256xf32> -> vector<1x256xf32>
    %14 = vector.broadcast %2 : f32 to vector<1x256xf32>
    %15 = arith.addf %13, %14 : vector<1x256xf32>
    %c0_9 = arith.constant 0 : index
    %16 = arith.index_cast %6 : i32 to index
    %17 = vector.load %arg5[%c0_9, %16] : memref<1x256xf32, #tpu.memory_space<vmem>>, vector<1x256xf32>
    tpu.vector_store %arg5[%c0_9, %16], %15 {strides = array<i32>} : memref<1x256xf32, #tpu.memory_space<vmem>>, vector<1x256xf32>,
    %c1_i32_10 = arith.constant 1 : i32
    return
  }
  func.func @transform_0(%arg0: i32) -> (i32, i32) {
    %c0_i32 = arith.constant 0 : i32
    %c0_i32_0 = arith.constant 0 : i32
    return %c0_i32, %arg0 : i32, i32
  }
  func.func @transform_1(%arg0: i32) -> (i32, i32) {
    %c0_i32 = arith.constant 0 : i32
    %c0_i32_0 = arith.constant 0 : i32
    %c0_i32_1 = arith.constant 0 : i32
    return %c0_i32, %c0_i32_0 : i32, i32
  }
  func.func @transform_2(%arg0: i32) -> (i32, i32) {
    %c0_i32 = arith.constant 0 : i32
    %c0_i32_0 = arith.constant 0 : i32
    %c0_i32_1 = arith.constant 0 : i32
    return %c0_i32, %c0_i32_0 : i32, i32
  }
  func.func @transform_3(%arg0: i32) -> (i32, i32) {
    %c0_i32 = arith.constant 0 : i32
    %c0_i32_0 = arith.constant 0 : i32
    %c0_i32_1 = arith.constant 0 : i32
    return %c0_i32, %c0_i32_0 : i32, i32
  }
  func.func @transform_4(%arg0: i32) -> (i32, i32) {
    %c0_i32 = arith.constant 0 : i32
    %c0_i32_0 = arith.constant 0 : i32
    return %c0_i32, %arg0 : i32, i32
  }
}

</mosaic_0001>

<bundles_post_ra>
// kernel: my_model_forward.1
= control target key start
LH: loop header
LB: loop body
LE: loop exit
PB: predicated region body
PF: predicated region fallthrough
CT: control target
= control target key end

     0   :  { %vm69_vm0 = vcmask 1044480   ;;  %vm70_vm1 = vcmask 1045504   ;;  %v274_v1 = vmov 0   ;;  %v275_v2 = vmov 65535   ;;  %s329_s0 = inlined_call_operand.vmem [shape: bf16[11,256], index: 0, kind: input, shape index: {}]   ;;  %s330_s1 = inlined_call_operand.vmem [shape: bf16[50,11], index: 1, kind: input, shape index: {}]   ;;  %s331_s2 = inlined_call_operand.vmem [shape: bf16[1,50], index: 2, kind: input, shape index: {}]   ;;  %s332_s3 = inlined_call_operand.<no memory space> [shape: f32[1,1], index: 3, kind: input, shape index: {}]   ;;  %s333_s4 = inlined_call_operand.vmem [shape: f32[1,256], index: 4, kind: output, shape index: {}]  }
   0x1   :  { %v267_v0 = vld [vmem:[%s329_s0 + $0x4] ss:$8 sps:$4 sm:$0x3f]   ;;  %111 = vmatprep.mubr.bf16.mxu0 %v274_v1  ;;  %216 = vmatprep.mubr.bf16.mxu1 %v274_v1  ;;  %v71_v3 = vsel %vm69_vm0, 4294967295, %v275_v2  ;;  %vm56_vm2 = vcmask 89088   ;;  %v272_v10 = vld [vmem:[%s330_s1 + $0x10] sm:$0xff]   ;;  %v231_v54 = vlaneseq  ;;  %v172_v55 = vstv %s332_s3 }
   0x2   :  { %v269_v4 = vld [vmem:[%s329_s0] ss:$8 sps:$4 sm:$0x3f]   ;;  %v72_v5 = vsel %vm70_vm1, %v71_v3, 0  ;;  %vm177_vm3 = vcmask 1040384   ;;  %vm173_vm4 = vcmask 408576  }
   0x3   :  { %v77_v6 = vand.u32 %v267_v0, %v72_v5  ;;  %v74_v7 = vand.u32 %v269_v4, %v72_v5  ;;  %v270_v8 = vld [vmem:[%s330_s1] sm:$0xff]   ;;  %v271_v9 = vld [vmem:[%s330_s1 + $0x8] sm:$0xff]   ;;  %v273_v11 = vld [vmem:[%s330_s1 + $0x18] ss:$0 sps:$4 sm:$0x11]   ;;  %v232_v57 = vshrl.u32 %v231_v54, 7 }
   0x4   :  { %v26_v51 = vld [vmem:[%s331_s2] sm:$0x1]  ;;  %v276_v52 = vmov 1966171168   ;;  %vm245_vm5 = vcmp.lt.s32.totalorder %v231_v54, 256 }
   0x5   :  { %79 = vmatprep.subr.bf16.mxu0 %v77_v6  ;;  %v229_v53 = vunpack.c.l.s4 %v276_v52 }
   0x6   :  { %80 = vmatpush1.bf16.msra.mxu0 %v74_v7 }
   0x7   :  { %v230_v56 = vunpack.c.0.s8 %v229_v53 }
   0x9   :  { %258 = vmatmul.mubr.msk.bf16.vlgmr.msra.gmra.mrb[0].mxu0 %vm56_vm2, %v270_v8  ;;  %v233_v62 = vsub.s32 %v230_v56, %v232_v57 }
   0xa   :  { %121 = vmatprep.mubr.bf16.mxu0 %v274_v1 }
  0x11   :  { %259 = vmatmul.mubr.msk.bf16.gmra.mrb[4].mxu0 %vm56_vm2, %v271_v9 }
  0x12   :  { %131 = vmatprep.mubr.bf16.mxu0 %v274_v1 }
  0x19   :  { %260 = vmatmul.mubr.msk.bf16.gmra.mrb[8].mxu0 %vm56_vm2, %v272_v10 }
  0x1a   :  { %141 = vmatprep.mubr.bf16.mxu0 %v274_v1 }
  0x21   :  { %261 = vmatmul.mubr.msk.bf16.gmra.mrb[12].mxu0 %vm56_vm2, %v273_v11 }
  0xdc   :  { %v113_v12 = vpop.f32.mrb[0].mxu0 }
  0xdd   :  { %v115_v13 = vpop.f32.mrb[1].mxu0  ;;  %v150_v15 = vmax.f32 %v113_v12, 0.0 }
  0xde   :  { %v117_v14 = vpop.f32.mrb[2].mxu0  ;;  %v151_v18 = vmax.f32 %v115_v13, 0.0 }
  0xdf   :  { %v152_v16 = vmax.f32 %v117_v14, 0.0  ;;  %v119_v17 = vpop.f32.mrb[3].mxu0 }
  0xe0   :  { %v153_v19 = vmax.f32 %v119_v17, 0.0 }
  0xe1   :  { %v164_v20 = vpack.c.bf16 %v152_v16, %v150_v15 }
  0xe2   :  { %v165_v21 = vpack.c.bf16 %v153_v19, %v151_v18 }
  0xe4   :  { %v123_v22 = vpop.f32.mrb[4].mxu0  ;;  %184 = vmatprep.subr.bf16.mxu1 %v165_v21 }
  0xe5   :  { %v125_v23 = vpop.f32.mrb[5].mxu0  ;;  %185 = vmatpush1.bf16.msra.mxu1 %v164_v20  ;;  %v154_v25 = vmax.f32 %v123_v22, 0.0 }
  0xe6   :  { %v127_v24 = vpop.f32.mrb[6].mxu0  ;;  %v155_v28 = vmax.f32 %v125_v23, 0.0 }
  0xe7   :  { %v156_v26 = vmax.f32 %v127_v24, 0.0  ;;  %v129_v27 = vpop.f32.mrb[7].mxu0 }
  0xe8   :  { %v157_v29 = vmax.f32 %v129_v27, 0.0 }
  0xe9   :  { %v166_v30 = vpack.c.bf16 %v156_v26, %v154_v25 }
  0xea   :  { %v167_v31 = vpack.c.bf16 %v157_v29, %v155_v28 }
  0xec   :  { %v133_v32 = vpop.f32.mrb[8].mxu0  ;;  %186 = vmatprep.subr.bf16.mxu1 %v167_v31 }
  0xed   :  { %v135_v33 = vpop.f32.mrb[9].mxu0  ;;  %187 = vmatpush1.bf16.msra.mxu1 %v166_v30  ;;  %v158_v35 = vmax.f32 %v133_v32, 0.0 }
  0xee   :  { %v137_v34 = vpop.f32.mrb[10].mxu0  ;;  %v159_v38 = vmax.f32 %v135_v33, 0.0 }
  0xef   :  { %v160_v36 = vmax.f32 %v137_v34, 0.0  ;;  %v139_v37 = vpop.f32.mrb[11].mxu0 }
  0xf0   :  { %v161_v39 = vmax.f32 %v139_v37, 0.0 }
  0xf1   :  { %v168_v40 = vpack.c.bf16 %v160_v36, %v158_v35 }
  0xf2   :  { %v169_v41 = vpack.c.bf16 %v161_v39, %v159_v38 }
  0xf4   :  { %v143_v42 = vpop.f32.mrb[12].mxu0  ;;  %188 = vmatprep.subr.bf16.mxu1 %v169_v41 }
  0xf5   :  { %v162_v43 = vmax.f32 %v143_v42, 0.0  ;;  %v145_v44 = vpop.f32.mrb[13].mxu0  ;;  %189 = vmatpush1.bf16.msra.mxu1 %v168_v40 }
  0xf6   :  { %v163_v45 = vmax.f32 %v145_v44, 0.0  ;;  %v147_v46 = vpop.f32.mrb[14].mxu0 }
  0xf7   :  { %v170_v47 = vpack.c.bf16 %v162_v43, %v162_v43  ;;  %v148_v48 = vpop.f32.mrb[15].mxu0 }
  0xf8   :  { %v171_v49 = vpack.c.bf16 %v163_v45, %v163_v45 }
  0xf9   :  { %v179_v50 = vsel %vm177_vm3, %v170_v47, 0 }
  0xfa   :  { %262 = vmatprep.subr.msk.bf16.mxu1 %vm177_vm3, %v171_v49 }
  0xfb   :  { %191 = vmatpush1.bf16.msra.mxu1 %v179_v50 }
  0xfe   :  { %263 = vmatmul.mubr.msk.bf16.vlgmr.msra.gmra.mrb[0].mxu1 %vm173_vm4, %v26_v51 }
 0x1d1   :  { %v218_v58 = vpop.f32.mrb[0].mxu1 }
 0x1d2   :  { %v219_v59 = vadd.f32 %v218_v58, %v172_v55  ;;  %v220_v60 = vpop.f32.mrb[1].mxu1 }
 0x1d3   :  { %v221_v61 = vadd.f32 %v220_v60, %v172_v55  ;;  %v222_v63 = vpop.f32.mrb[2].mxu1 }
 0x1d4   :  { %v223_v0 = vpop.f32.mrb[3].mxu1 }
 0x1d5   :  { %v227_v1 = vcombine.low %v219_v59, %v221_v61 }
 0x1d7   :  { %v234_v2 = vrot.slane %v227_v1, %v233_v62 }
 0x1d9   :  { %v241_v3 = vrot.slane %v234_v2, %v233_v62 }
 0x1db   :  { %247 = vst.msk [vmem:[%s333_s4] sm:$0x3] %vm245_vm5, %v241_v3 }

</bundles_post_ra>
